<compile_context>
chip_gen: v7x
topology: tpu7x:2x2x1
jax: 0.10.0
libtpu: 0.0.40
codegen_flags: <defaults>
</compile_context>

<pallas_src>
import math

import jax
import jax.numpy as jnp
from jax.experimental import pallas as pl
from jax.experimental.pallas import tpu as pltpu

LN_EPS = 1e-5


def _syntax_embed_kernel(comb_ref, syn_ref, elem_tab_ref, w1_ref, vec1_ref,
                         w2_ref, vec2_ref, out_ref):
    f32 = jnp.float32

    # --- syntax feature projection: Linear(3,D/4) -> LayerNorm -> ReLU -> Linear(D/4,D)
    # K=3 contraction as three broadcasted VPU FMAs (MXU kept only for D/4 -> D).
    s4 = syn_ref[...]                                          # (T, 4) f32: [syn0, syn1, syn2, elem_id]
    w1 = w1_ref[...]                                           # (3, D4)
    h = (s4[:, 0:1] * w1[0:1, :]
         + s4[:, 1:2] * w1[1:2, :]
         + s4[:, 2:3] * w1[2:3, :]
         + vec1_ref[0:1, :])                                   # + b1      (T, D4)
    mu1 = jnp.mean(h, axis=-1, keepdims=True)
    var1 = jnp.mean((h - mu1) ** 2, axis=-1, keepdims=True)
    h = (h - mu1) * jax.lax.rsqrt(var1 + LN_EPS) * vec1_ref[1:2, :] + vec1_ref[2:3, :]
    h = jnp.maximum(h, 0.0)
    syn_emb = jnp.dot(h, w2_ref[...], preferred_element_type=f32,
                      precision=jax.lax.Precision.HIGHEST) + vec2_ref[0:1, :]

    # --- elem-type embedding: 3-row table selected in VMEM (no [N, D] HBM stream)
    e = s4[:, 3:4]                                             # (T, 1) f32 in {0, 1, 2}
    tab = elem_tab_ref[...]                                    # (3, D)
    elem_emb = ((e == 0.0).astype(f32) * tab[0:1, :]
                + (e == 1.0).astype(f32) * tab[1:2, :]
                + (e == 2.0).astype(f32) * tab[2:3, :])

    # --- combine: comb_ref already holds tok*sqrt(D) + pos_tag_emb + pos_encoding
    comb = comb_ref[...].astype(f32)
    comb = comb + elem_emb
    comb = comb + syn_emb

    # --- final LayerNorm over d_model
    mu2 = jnp.mean(comb, axis=-1, keepdims=True)
    var2 = jnp.mean((comb - mu2) ** 2, axis=-1, keepdims=True)
    out = (comb - mu2) * jax.lax.rsqrt(var2 + LN_EPS) * vec2_ref[1:2, :] + vec2_ref[2:3, :]

    # Dropout: identity (eval mode).
    out_ref[...] = out.astype(out_ref.dtype)


def _vmem_budgets():
    """(tile budget, vmem_limit cap) chosen per TPU generation."""
    cap = 32 << 20
    try:
        info = pltpu.get_tpu_info()
        cap = int(getattr(info, "vmem_capacity_bytes", cap) or cap)
    except Exception:
        pass
    if cap >= (100 << 20):            # 128 MiB VMEM parts: v5e / v6e
        return 48 << 20, 96 << 20
    return 20 << 20, 44 << 20         # 64 MiB VMEM (v7x) or unknown: stay conservative


def _pick_tile_s(S, B, bytes_per_row, vmem_budget, multiple):
    """Largest seq tile that divides S, is a multiple of `multiple` (or == S),
    fits the double-buffered pipelined footprint, and keeps >= 2 grid steps
    on the parallel axes when B < 2 (v7x megacore)."""
    cap_rows = max(multiple, int(vmem_budget // max(bytes_per_row, 1)))
    if B < 2 and S >= 2 * multiple:
        cap_rows = min(cap_rows, S // 2)
    if S <= cap_rows:
        return S                              # full-dim block is always layout-legal
    t = (min(cap_rows, S) // multiple) * multiple
    while t >= multiple:
        if S % t == 0:
            return t
        t -= multiple
    # No aligned divisor fits the budget; full-S is the only legal block left.
    assert S * bytes_per_row <= 2 * vmem_budget, (
        f"seq_len={S} has no VMEM-fitting tile; pad seq_len to a multiple of {multiple}")
    return S


def syntax_aware_embedding(token_ids, pos_tags, elem_types, syntax_features,
                           params, *, d_model, tile_s=None,
                           stream_dtype=jnp.bfloat16, out_dtype=jnp.float32):
    """Fused forward pass (eval mode). token_ids/pos_tags/elem_types: [B, S] int,
    syntax_features: [B, S, 3]. Returns [B, S, d_model] in out_dtype.

    stream_dtype: dtype of the combined HBM row stream fed to the kernel
    (bfloat16 default halves the dominant read traffic; float32 = exact parity).
    out_dtype: output dtype (bfloat16 halves the write stream if acceptable)."""
    B, S = token_ids.shape
    D = d_model
    assert D % 4 == 0, "d_model must be divisible by 4 (syntax proj uses d_model//4)"
    D4 = D // 4

    stream_bytes = jnp.dtype(stream_dtype).itemsize
    out_bytes = jnp.dtype(out_dtype).itemsize
    # sublane packing: 16-row multiples for 16-bit streamed/stored dtypes
    multiple = 16 if min(stream_bytes, out_bytes) < 4 else 8

    tile_budget, limit_cap = _vmem_budgets()
    # Double-buffered per-seq-row footprint: combined stream + (T,4) stream + output.
    bytes_per_row = 2 * (stream_bytes * D + 4 * 4 + out_bytes * D)
    if tile_s is None:
        tile_s = _pick_tile_s(S, B, bytes_per_row, tile_budget, multiple)
    assert S % tile_s == 0
    assert tile_s % multiple == 0 or tile_s == S

    scale = math.sqrt(float(D))

    # --- XLA glue: the unavoidable embedding gathers, pre-summed into ONE
    # (B, S, D) stream (cuts intermediate HBM writes and kernel reads ~2x).
    tok_emb = jnp.take(params["token_embedding"], token_ids.astype(jnp.int32), axis=0)
    pos_emb = jnp.take(params["pos_tag_embedding"], pos_tags.astype(jnp.int32), axis=0)
    penc = params["positional_encoding"][:S]                             # (S, D)
    combined = (tok_emb * scale + pos_emb + penc[None, :, :]).astype(stream_dtype)

    # Merge the two narrow streams: [syntax_features | elem_type] -> (B, S, 4) f32.
    syn4 = jnp.concatenate(
        [syntax_features.astype(jnp.float32),
         elem_types.astype(jnp.float32)[..., None]], axis=-1)

    elem_tab = params["elem_type_embedding"]                             # (3, D)
    w1 = params["syn_w1"]                                                # (3, D4)
    w2 = params["syn_w2"]                                                # (D4, D)
    vec1 = jnp.stack([params["syn_b1"], params["syn_ln_g"], params["syn_ln_b"]])  # (3, D4)
    vec2 = jnp.stack([params["syn_b2"], params["ln_g"], params["ln_b"]])          # (3, D)

    # Grid: seq-tile outer, batch inner -> weight/PE block indices constant on
    # the inner axis; both axes "parallel" for megacore sharding.
    grid = (S // tile_s, B)

    def row_spec(last):
        return pl.BlockSpec((None, tile_s, last), lambda si, b: (b, si, 0))

    def const_spec(shape):
        return pl.BlockSpec(shape, lambda si, b: (0, 0))

    weights_bytes = 2 * 4 * (3 * D + 3 * D4 + 3 * D4 + D4 * D + 3 * D)   # double-buffered
    footprint = tile_s * bytes_per_row + weights_bytes
    vmem_limit = int(min(max(2 * footprint, 32 << 20), limit_cap))

    out = pl.pallas_call(
        _syntax_embed_kernel,
        out_shape=jax.ShapeDtypeStruct((B, S, D), out_dtype),
        grid_spec=pltpu.PrefetchScalarGridSpec(
            num_scalar_prefetch=0,
            grid=grid,
            in_specs=[
                row_spec(D),            # combined row stream (tok*scale + pos + penc)
                row_spec(4),            # [syntax features | elem-type id] (f32)
                const_spec((3, D)),     # elem-type table
                const_spec((3, D4)),    # w1
                const_spec((3, D4)),    # [b1; ln_g1; ln_b1]
                const_spec((D4, D)),    # w2
                const_spec((3, D)),     # [b2; ln_g; ln_b]
            ],
            out_specs=pl.BlockSpec((None, tile_s, D), lambda si, b: (b, si, 0)),
        ),
        compiler_params=pltpu.CompilerParams(
            dimension_semantics=("parallel", "parallel"),
            vmem_limit_bytes=vmem_limit),
    )(combined, syn4, elem_tab, w1, vec1, w2, vec2)

    return out


def make_positional_encoding(max_length, d_model):
    """Matches the PyTorch sinusoidal positional encoding."""
    position = jnp.arange(max_length, dtype=jnp.float32)[:, None]          # (L, 1)
    div_term = jnp.exp(jnp.arange(0, d_model, 2, dtype=jnp.float32)
                       * (-math.log(10000.0) / d_model))                    # (D/2,)
    pe = jnp.zeros((max_length, d_model), dtype=jnp.float32)
    pe = pe.at[:, 0::2].set(jnp.sin(position * div_term))
    pe = pe.at[:, 1::2].set(jnp.cos(position * div_term))
    return pe


def init_params(key, vocab_size, d_model, max_length):
    assert d_model % 4 == 0
    d4 = d_model // 4
    ks = jax.random.split(key, 8)
    return {
        "token_embedding": jax.random.normal(ks[0], (vocab_size, d_model), jnp.float32) * 0.02,
        "pos_tag_embedding": jax.random.normal(ks[1], (vocab_size, d_model), jnp.float32) * 0.02,
        "elem_type_embedding": jax.random.normal(ks[2], (3, d_model), jnp.float32) * 0.02,
        "positional_encoding": make_positional_encoding(max_length, d_model),
        # syntax_feature_proj: Linear(3, D/4) -> LayerNorm(D/4) -> ReLU -> Linear(D/4, D)
        "syn_w1": jax.random.normal(ks[3], (3, d4), jnp.float32) * (1.0 / math.sqrt(3.0)),
        "syn_b1": jax.random.normal(ks[4], (d4,), jnp.float32) * 0.01,
        "syn_ln_g": jnp.ones((d4,), jnp.float32),
        "syn_ln_b": jnp.zeros((d4,), jnp.float32),
        "syn_w2": jax.random.normal(ks[5], (d4, d_model), jnp.float32) * (1.0 / math.sqrt(d4)),
        "syn_b2": jax.random.normal(ks[6], (d_model,), jnp.float32) * 0.01,
        # final LayerNorm(d_model)
        "ln_g": jnp.ones((d_model,), jnp.float32),
        "ln_b": jnp.zeros((d_model,), jnp.float32),
    }


def _reference(token_ids, pos_tags, elem_types, syntax_features, params, *, d_model):
    """Pure-JAX reference mirroring the PyTorch module (eval mode)."""
    hi = jax.lax.Precision.HIGHEST
    tok = jnp.take(params["token_embedding"], token_ids, axis=0) * math.sqrt(float(d_model))
    pos = jnp.take(params["pos_tag_embedding"], pos_tags, axis=0)
    elem = jnp.take(params["elem_type_embedding"], elem_types, axis=0)
    x = syntax_features.astype(jnp.float32)

    h = jnp.dot(x, params["syn_w1"], precision=hi) + params["syn_b1"]
    mu = jnp.mean(h, -1, keepdims=True)
    var = jnp.mean((h - mu) ** 2, -1, keepdims=True)
    h = (h - mu) * jax.lax.rsqrt(var + LN_EPS) * params["syn_ln_g"] + params["syn_ln_b"]
    h = jnp.maximum(h, 0.0)
    syn = jnp.dot(h, params["syn_w2"], precision=hi) + params["syn_b2"]

    S = token_ids.shape[1]
    comb = tok + pos + elem + syn + params["positional_encoding"][:S][None, :, :]
    mu = jnp.mean(comb, -1, keepdims=True)
    var = jnp.mean((comb - mu) ** 2, -1, keepdims=True)
    return (comb - mu) * jax.lax.rsqrt(var + LN_EPS) * params["ln_g"] + params["ln_b"]


if __name__ == "__main__":
    vocab_size = 32
    d_model = 128      # multiple of 128 -> lane-dense output stores
    max_length = 64
    batch = 2
    seq = 16

    key = jax.random.PRNGKey(0)
    kp, k1, k2, k3, k4 = jax.random.split(key, 5)
    params = init_params(kp, vocab_size, d_model, max_length)

    token_ids = jax.random.randint(k1, (batch, seq), 0, vocab_size, dtype=jnp.int32)
    pos_tags = jax.random.randint(k2, (batch, seq), 0, vocab_size, dtype=jnp.int32)
    elem_types = jax.random.randint(k3, (batch, seq), 0, 3, dtype=jnp.int32)
    syntax_features = jax.random.uniform(k4, (batch, seq, 3), dtype=jnp.float32)

    ref = _reference(token_ids, pos_tags, elem_types, syntax_features,
                     params, d_model=d_model)

    # Exact path: f32 streaming -> tight parity against the reference.
    out_f32 = syntax_aware_embedding(token_ids, pos_tags, elem_types, syntax_features,
                                     params, d_model=d_model,
                                     stream_dtype=jnp.float32)
    out_f32 = jax.block_until_ready(out_f32)
    assert out_f32.shape == (batch, seq, d_model)
    assert bool(jnp.all(jnp.isfinite(out_f32)))
    assert bool(jnp.allclose(out_f32, ref, atol=3e-3, rtol=0.0))

    # Default fast path: bf16 streaming of the combined row stream (f32 compute).
    out_fast = syntax_aware_embedding(token_ids, pos_tags, elem_types, syntax_features,
                                      params, d_model=d_model)
    out_fast = jax.block_until_ready(out_fast)
    assert out_fast.shape == (batch, seq, d_model)
    assert bool(jnp.all(jnp.isfinite(out_fast)))
    assert bool(jnp.allclose(out_fast, ref, atol=5e-2, rtol=0.0))

    print("KERNEL_OK")
</pallas_src>

<mosaic_0001>
module attributes {stable_mosaic.version = 11 : i64} {
  func.func @_syntax_embed_kernel(%arg0: i32, %arg1: i32, %arg2: memref<1x16x128xf32, #tpu.memory_space<vmem>>, %arg3: memref<1x16x4xf32, #tpu.memory_space<vmem>>, %arg4: memref<3x128xf32, #tpu.memory_space<vmem>>, %arg5: memref<3x32xf32, #tpu.memory_space<vmem>>, %arg6: memref<3x32xf32, #tpu.memory_space<vmem>>, %arg7: memref<32x128xf32, #tpu.memory_space<vmem>>, %arg8: memref<3x128xf32, #tpu.memory_space<vmem>>, %arg9: memref<1x16x128xf32, #tpu.memory_space<vmem>>) attributes {dimension_semantics = [#tpu.dimension_semantics<parallel>, #tpu.dimension_semantics<parallel>], iteration_bounds = array<i64: 1, 2>, scalar_prefetch = 0 : i64, scratch_operands = 0 : i64, tpu.core_type = #tpu.core_type<tc>, window_params = [{transform_indices = @transform_0, window_bounds = array<i64: 1, 16, 128>}, {transform_indices = @transform_1, window_bounds = array<i64: 1, 16, 4>}, {pipeline_mode = #tpu.pipeline_mode<synchronous>, transform_indices = @transform_2, window_bounds = array<i64: 3, 128>}, {pipeline_mode = #tpu.pipeline_mode<synchronous>, transform_indices = @transform_3, window_bounds = array<i64: 3, 32>}, {pipeline_mode = #tpu.pipeline_mode<synchronous>, transform_indices = @transform_4, window_bounds = array<i64: 3, 32>}, {pipeline_mode = #tpu.pipeline_mode<synchronous>, transform_indices = @transform_5, window_bounds = array<i64: 32, 128>}, {pipeline_mode = #tpu.pipeline_mode<synchronous>, transform_indices = @transform_6, window_bounds = array<i64: 3, 128>}, {transform_indices = @transform_7, window_bounds = array<i64: 1, 16, 128>}]} {
    %c0 = arith.constant 0 : index
    %c0_0 = arith.constant 0 : index
    %c0_1 = arith.constant 0 : index
    %0 = vector.load %arg3[%c0, %c0_0, %c0_1] : memref<1x16x4xf32, #tpu.memory_space<vmem>>, vector<1x16x4xf32>
    %1 = vector.shape_cast %0 : vector<1x16x4xf32> to vector<16x4xf32>
    %c0_2 = arith.constant 0 : index
    %c0_3 = arith.constant 0 : index
    %2 = vector.load %arg5[%c0_2, %c0_3] : memref<3x32xf32, #tpu.memory_space<vmem>>, vector<3x32xf32>
    %3 = vector.extract_strided_slice %1 {offsets = [0, 0], sizes = [16, 1], strides = [1, 1]} : vector<16x4xf32> to vector<16x1xf32>
    %4 = vector.extract_strided_slice %2 {offsets = [0, 0], sizes = [1, 32], strides = [1, 1]} : vector<3x32xf32> to vector<1x32xf32>
    %5 = vector.broadcast %3 : vector<16x1xf32> to vector<16x32xf32>
    %6 = vector.broadcast %4 : vector<1x32xf32> to vector<16x32xf32>
    %7 = arith.mulf %5, %6 : vector<16x32xf32>
    %8 = vector.extract_strided_slice %1 {offsets = [0, 1], sizes = [16, 1], strides = [1, 1]} : vector<16x4xf32> to vector<16x1xf32>
    %9 = vector.extract_strided_slice %2 {offsets = [1, 0], sizes = [1, 32], strides = [1, 1]} : vector<3x32xf32> to vector<1x32xf32>
    %10 = vector.broadcast %8 : vector<16x1xf32> to vector<16x32xf32>
    %11 = vector.broadcast %9 : vector<1x32xf32> to vector<16x32xf32>
    %12 = arith.mulf %10, %11 : vector<16x32xf32>
    %13 = arith.addf %7, %12 : vector<16x32xf32>
    %14 = vector.extract_strided_slice %1 {offsets = [0, 2], sizes = [16, 1], strides = [1, 1]} : vector<16x4xf32> to vector<16x1xf32>
    %15 = vector.extract_strided_slice %2 {offsets = [2, 0], sizes = [1, 32], strides = [1, 1]} : vector<3x32xf32> to vector<1x32xf32>
    %16 = vector.broadcast %14 : vector<16x1xf32> to vector<16x32xf32>
    %17 = vector.broadcast %15 : vector<1x32xf32> to vector<16x32xf32>
    %18 = arith.mulf %16, %17 : vector<16x32xf32>
    %19 = arith.addf %13, %18 : vector<16x32xf32>
    %c0_4 = arith.constant 0 : index
    %c0_5 = arith.constant 0 : index
    %20 = vector.load %arg6[%c0_4, %c0_5] : memref<3x32xf32, #tpu.memory_space<vmem>>, vector<1x32xf32>
    %21 = vector.broadcast %20 : vector<1x32xf32> to vector<16x32xf32>
    %22 = arith.addf %19, %21 : vector<16x32xf32>
    %cst = arith.constant dense<0.000000e+00> : vector<16xf32>
    %23 = vector.multi_reduction <add>, %22, %cst [1] : vector<16x32xf32> to vector<16xf32>
    %24 = vector.shape_cast %23 : vector<16xf32> to vector<16x1xf32>
    %cst_6 = arith.constant 3.200000e+01 : f32
    %25 = vector.broadcast %cst_6 : f32 to vector<16x1xf32>
    %26 = arith.divf %24, %25 : vector<16x1xf32>
    %27 = vector.broadcast %26 : vector<16x1xf32> to vector<16x32xf32>
    %28 = arith.subf %22, %27 : vector<16x32xf32>
    %29 = arith.mulf %28, %28 : vector<16x32xf32>
    %cst_7 = arith.constant dense<0.000000e+00> : vector<16xf32>
    %30 = vector.multi_reduction <add>, %29, %cst_7 [1] : vector<16x32xf32> to vector<16xf32>
    %31 = vector.shape_cast %30 : vector<16xf32> to vector<16x1xf32>
    %cst_8 = arith.constant 3.200000e+01 : f32
    %32 = vector.broadcast %cst_8 : f32 to vector<16x1xf32>
    %33 = arith.divf %31, %32 : vector<16x1xf32>
    %34 = vector.broadcast %26 : vector<16x1xf32> to vector<16x32xf32>
    %35 = arith.subf %22, %34 : vector<16x32xf32>
    %cst_9 = arith.constant 9.99999974E-6 : f32
    %36 = vector.broadcast %cst_9 : f32 to vector<16x1xf32>
    %37 = arith.addf %33, %36 : vector<16x1xf32>
    %38 = math.rsqrt %37 : vector<16x1xf32>
    %39 = vector.broadcast %38 : vector<16x1xf32> to vector<16x32xf32>
    %40 = arith.mulf %35, %39 : vector<16x32xf32>
    %c1 = arith.constant 1 : index
    %c0_10 = arith.constant 0 : index
    %41 = vector.load %arg6[%c1, %c0_10] : memref<3x32xf32, #tpu.memory_space<vmem>>, vector<1x32xf32>
    %42 = vector.broadcast %41 : vector<1x32xf32> to vector<16x32xf32>
    %43 = arith.mulf %40, %42 : vector<16x32xf32>
    %c2 = arith.constant 2 : index
    %c0_11 = arith.constant 0 : index
    %44 = vector.load %arg6[%c2, %c0_11] : memref<3x32xf32, #tpu.memory_space<vmem>>, vector<1x32xf32>
    %45 = vector.broadcast %44 : vector<1x32xf32> to vector<16x32xf32>
    %46 = arith.addf %43, %45 : vector<16x32xf32>
    %cst_12 = arith.constant 0.000000e+00 : f32
    %47 = vector.broadcast %cst_12 : f32 to vector<16x32xf32>
    %48 = arith.maximumf %46, %47 : vector<16x32xf32>
    %c0_13 = arith.constant 0 : index
    %c0_14 = arith.constant 0 : index
    %49 = vector.load %arg7[%c0_13, %c0_14] : memref<32x128xf32, #tpu.memory_space<vmem>>, vector<32x128xf32>
    %cst_15 = arith.constant dense<0.000000e+00> : vector<16x128xf32>
    %50 = tpu.matmul %48, %49, %cst_15 {dimension_numbers = #tpu.dot_dimension_numbers<[1], [0], [0], [1], [0, 0, 1, 1], [], []>, precision = #tpu.contract_precision<fp32>} : vector<16x32xf32>, vector<32x128xf32>, vector<16x128xf32> -> vector<16x128xf32>
    %c0_16 = arith.constant 0 : index
    %c0_17 = arith.constant 0 : index
    %51 = vector.load %arg8[%c0_16, %c0_17] : memref<3x128xf32, #tpu.memory_space<vmem>>, vector<1x128xf32>
    %52 = vector.broadcast %51 : vector<1x128xf32> to vector<16x128xf32>
    %53 = arith.addf %50, %52 : vector<16x128xf32>
    %54 = vector.extract_strided_slice %1 {offsets = [0, 3], sizes = [16, 1], strides = [1, 1]} : vector<16x4xf32> to vector<16x1xf32>
    %c0_18 = arith.constant 0 : index
    %c0_19 = arith.constant 0 : index
    %55 = vector.load %arg4[%c0_18, %c0_19] : memref<3x128xf32, #tpu.memory_space<vmem>>, vector<3x128xf32>
    %cst_20 = arith.constant 0.000000e+00 : f32
    %56 = vector.broadcast %cst_20 : f32 to vector<16x1xf32>
    %57 = arith.cmpf oeq, %54, %56 : vector<16x1xf32>
    %58 = arith.extui %57 : vector<16x1xi1> to vector<16x1xi32>
    %59 = arith.sitofp %58 : vector<16x1xi32> to vector<16x1xf32>
    %60 = vector.extract_strided_slice %55 {offsets = [0, 0], sizes = [1, 128], strides = [1, 1]} : vector<3x128xf32> to vector<1x128xf32>
    %61 = vector.broadcast %59 : vector<16x1xf32> to vector<16x128xf32>
    %62 = vector.broadcast %60 : vector<1x128xf32> to vector<16x128xf32>
    %63 = arith.mulf %61, %62 : vector<16x128xf32>
    %cst_21 = arith.constant 1.000000e+00 : f32
    %64 = vector.broadcast %cst_21 : f32 to vector<16x1xf32>
    %65 = arith.cmpf oeq, %54, %64 : vector<16x1xf32>
    %66 = arith.extui %65 : vector<16x1xi1> to vector<16x1xi32>
    %67 = arith.sitofp %66 : vector<16x1xi32> to vector<16x1xf32>
    %68 = vector.extract_strided_slice %55 {offsets = [1, 0], sizes = [1, 128], strides = [1, 1]} : vector<3x128xf32> to vector<1x128xf32>
    %69 = vector.broadcast %67 : vector<16x1xf32> to vector<16x128xf32>
    %70 = vector.broadcast %68 : vector<1x128xf32> to vector<16x128xf32>
    %71 = arith.mulf %69, %70 : vector<16x128xf32>
    %72 = arith.addf %63, %71 : vector<16x128xf32>
    %cst_22 = arith.constant 2.000000e+00 : f32
    %73 = vector.broadcast %cst_22 : f32 to vector<16x1xf32>
    %74 = arith.cmpf oeq, %54, %73 : vector<16x1xf32>
    %75 = arith.extui %74 : vector<16x1xi1> to vector<16x1xi32>
    %76 = arith.sitofp %75 : vector<16x1xi32> to vector<16x1xf32>
    %77 = vector.extract_strided_slice %55 {offsets = [2, 0], sizes = [1, 128], strides = [1, 1]} : vector<3x128xf32> to vector<1x128xf32>
    %78 = vector.broadcast %76 : vector<16x1xf32> to vector<16x128xf32>
    %79 = vector.broadcast %77 : vector<1x128xf32> to vector<16x128xf32>
    %80 = arith.mulf %78, %79 : vector<16x128xf32>
    %81 = arith.addf %72, %80 : vector<16x128xf32>
    %c0_23 = arith.constant 0 : index
    %c0_24 = arith.constant 0 : index
    %c0_25 = arith.constant 0 : index
    %82 = vector.load %arg2[%c0_23, %c0_24, %c0_25] : memref<1x16x128xf32, #tpu.memory_space<vmem>>, vector<1x16x128xf32>
    %83 = vector.shape_cast %82 : vector<1x16x128xf32> to vector<16x128xf32>
    %84 = arith.addf %83, %81 : vector<16x128xf32>
    %85 = arith.addf %84, %53 : vector<16x128xf32>
    %cst_26 = arith.constant dense<0.000000e+00> : vector<16xf32>
    %86 = vector.multi_reduction <add>, %85, %cst_26 [1] : vector<16x128xf32> to vector<16xf32>
    %87 = vector.shape_cast %86 : vector<16xf32> to vector<16x1xf32>
    %cst_27 = arith.constant 1.280000e+02 : f32
    %88 = vector.broadcast %cst_27 : f32 to vector<16x1xf32>
    %89 = arith.divf %87, %88 : vector<16x1xf32>
    %90 = vector.broadcast %89 : vector<16x1xf32> to vector<16x128xf32>
    %91 = arith.subf %85, %90 : vector<16x128xf32>
    %92 = arith.mulf %91, %91 : vector<16x128xf32>
    %cst_28 = arith.constant dense<0.000000e+00> : vector<16xf32>
    %93 = vector.multi_reduction <add>, %92, %cst_28 [1] : vector<16x128xf32> to vector<16xf32>
    %94 = vector.shape_cast %93 : vector<16xf32> to vector<16x1xf32>
    %cst_29 = arith.constant 1.280000e+02 : f32
    %95 = vector.broadcast %cst_29 : f32 to vector<16x1xf32>
    %96 = arith.divf %94, %95 : vector<16x1xf32>
    %97 = vector.broadcast %89 : vector<16x1xf32> to vector<16x128xf32>
    %98 = arith.subf %85, %97 : vector<16x128xf32>
    %cst_30 = arith.constant 9.99999974E-6 : f32
    %99 = vector.broadcast %cst_30 : f32 to vector<16x1xf32>
    %100 = arith.addf %96, %99 : vector<16x1xf32>
    %101 = math.rsqrt %100 : vector<16x1xf32>
    %102 = vector.broadcast %101 : vector<16x1xf32> to vector<16x128xf32>
    %103 = arith.mulf %98, %102 : vector<16x128xf32>
    %c1_31 = arith.constant 1 : index
    %c0_32 = arith.constant 0 : index
    %104 = vector.load %arg8[%c1_31, %c0_32] : memref<3x128xf32, #tpu.memory_space<vmem>>, vector<1x128xf32>
    %105 = vector.broadcast %104 : vector<1x128xf32> to vector<16x128xf32>
    %106 = arith.mulf %103, %105 : vector<16x128xf32>
    %c2_33 = arith.constant 2 : index
    %c0_34 = arith.constant 0 : index
    %107 = vector.load %arg8[%c2_33, %c0_34] : memref<3x128xf32, #tpu.memory_space<vmem>>, vector<1x128xf32>
    %108 = vector.broadcast %107 : vector<1x128xf32> to vector<16x128xf32>
    %109 = arith.addf %106, %108 : vector<16x128xf32>
    %c0_35 = arith.constant 0 : index
    %c0_36 = arith.constant 0 : index
    %c0_37 = arith.constant 0 : index
    %110 = vector.load %arg9[%c0_35, %c0_36, %c0_37] : memref<1x16x128xf32, #tpu.memory_space<vmem>>, vector<1x16x128xf32>
    %111 = vector.shape_cast %110 : vector<1x16x128xf32> to vector<16x128xf32>
    %112 = vector.shape_cast %109 : vector<16x128xf32> to vector<1x16x128xf32>
    tpu.vector_store %arg9[%c0_35, %c0_36, %c0_37], %112 {strides = array<i32>} : memref<1x16x128xf32, #tpu.memory_space<vmem>>, vector<1x16x128xf32>,
    return
  }
  func.func @transform_0(%arg0: i32, %arg1: i32) -> (i32, i32, i32) {
    %c0_i32 = arith.constant 0 : i32
    %c0_i32_0 = arith.constant 0 : i32
    return %arg1, %arg0, %c0_i32 : i32, i32, i32
  }
  func.func @transform_1(%arg0: i32, %arg1: i32) -> (i32, i32, i32) {
    %c0_i32 = arith.constant 0 : i32
    %c0_i32_0 = arith.constant 0 : i32
    return %arg1, %arg0, %c0_i32 : i32, i32, i32
  }
  func.func @transform_2(%arg0: i32, %arg1: i32) -> (i32, i32) {
    %c0_i32 = arith.constant 0 : i32
    %c0_i32_0 = arith.constant 0 : i32
    %c0_i32_1 = arith.constant 0 : i32
    return %c0_i32, %c0_i32_0 : i32, i32
  }
  func.func @transform_3(%arg0: i32, %arg1: i32) -> (i32, i32) {
    %c0_i32 = arith.constant 0 : i32
    %c0_i32_0 = arith.constant 0 : i32
    %c0_i32_1 = arith.constant 0 : i32
    return %c0_i32, %c0_i32_0 : i32, i32
  }
  func.func @transform_4(%arg0: i32, %arg1: i32) -> (i32, i32) {
    %c0_i32 = arith.constant 0 : i32
    %c0_i32_0 = arith.constant 0 : i32
    %c0_i32_1 = arith.constant 0 : i32
    return %c0_i32, %c0_i32_0 : i32, i32
  }
  func.func @transform_5(%arg0: i32, %arg1: i32) -> (i32, i32) {
    %c0_i32 = arith.constant 0 : i32
    %c0_i32_0 = arith.constant 0 : i32
    %c0_i32_1 = arith.constant 0 : i32
    return %c0_i32, %c0_i32_0 : i32, i32
  }
  func.func @transform_6(%arg0: i32, %arg1: i32) -> (i32, i32) {
    %c0_i32 = arith.constant 0 : i32
    %c0_i32_0 = arith.constant 0 : i32
    %c0_i32_1 = arith.constant 0 : i32
    return %c0_i32, %c0_i32_0 : i32, i32
  }
  func.func @transform_7(%arg0: i32, %arg1: i32) -> (i32, i32, i32) {
    %c0_i32 = arith.constant 0 : i32
    %c0_i32_0 = arith.constant 0 : i32
    return %arg1, %arg0, %c0_i32 : i32, i32, i32
  }
}

</mosaic_0001>

<bundles_post_ra>
// kernel: tpu_custom_call.1
= control target key start
LH: loop header
LB: loop body
LE: loop exit
PB: predicated region body
PF: predicated region fallthrough
CT: control target
= control target key end

     0   :  { %12 = vsyncpa [#allocation3], 0  ;;  %s1984_s0 = inlined_call_operand.vmem [shape: f32[2,16,128], index: 0, kind: input, shape index: {}]   ;;  %s1985_s1 = inlined_call_operand.vmem [shape: f32[2,16,4], index: 1, kind: input, shape index: {}]   ;;  %s1986_s2 = inlined_call_operand.vmem [shape: f32[3,128], index: 2, kind: input, shape index: {}]   ;;  %s1987_s3 = inlined_call_operand.vmem [shape: f32[3,32], index: 3, kind: input, shape index: {}]   ;;  %s1988_s4 = inlined_call_operand.vmem [shape: f32[3,32], index: 4, kind: input, shape index: {}]   ;;  %s1989_s5 = inlined_call_operand.hbm [shape: f32[32,128], index: 5, kind: input, shape index: {}]   ;;  %s1990_s6 = inlined_call_operand.vmem [shape: f32[3,128], index: 6, kind: input, shape index: {}]   ;;  %s1991_s7 = inlined_call_operand.hbm [shape: f32[2,16,128], index: 7, kind: output, shape index: {}]  }
   0x1   :  { %13 = vsyncpa [#allocation4], 0 }
   0x2   :  { %15 = vsyncpa [#allocation4 + $0x1], 0  ;;  %s1708_s24 = smov 0   ;;  %s1710_s25 = smov 0  }
   0x3   :  { %s1712_s26 = smov 0   ;;  %s1714_s27 = smov 0  }
   0x4   :  { %s1716_s28 = smov 0   ;;  %s1718_s29 = smov 0  }
   0x5 LB: > { %s1245_s30 = sadd.s32 4294967295, %s1655_s29   ;;  %s1246_s8 = sadd.s32 4294967294, %s1655_s29   ;;  %s1655_s29 = sphi %s1718_s29, %s21_s29   ;;  %s1651_s28 = sphi %s1716_s28, %s2009_s28   ;;  %s1647_s27 = sphi %s1714_s27, %s2008_s27   ;;  %s1643_s26 = sphi %s1712_s26, %s2007_s26   ;;  %s1639_s25 = sphi %s1710_s25, %s2006_s25   ;;  %s1635_s24 = sphi %s1708_s24, %s2005_s24  }
   0x6   : > { %s30_s9 = sadd.s32 1, %s1651_s28  ;;  %s203_s10 = sadd.s32 1, %s1643_s26 }
   0x7   : > { %p31_p0 = scmp.ge.s32.totalorder %s30_s9, 2  ;;  %p213_p1 = scmp.ne.s32.totalorder %s1643_s26, %s1639_s25 }
   0x8   : > { %p214_p2 = scmp.eq.s32.totalorder %s1245_s30, 1  ;;  %p219_p3 = scmp.ne.s32.totalorder %s1639_s25, %s1635_s24 }
   0x9   : > { %s2011_s9 = smov (%p31_p0, %s30_s9), 0  ;;  %p220_p5 = scmp.eq.s32.totalorder %s1246_s8, 1 }
   0xa   : > { %p1748_p4 = por %p214_p2, %p213_p1  ;;  %s198_s12 = ssub.s32 %s1651_s28, %s2011_s9 }
   0xb   : > { %p1247_p6 = scmp.ge.s32.totalorder %s1655_s29, 1  ;;  %p201_p7 = scmp.eq.s32.totalorder %s198_s12, 0 }
   0xc   : > { %s1996_s11 = scalar_select %p1748_p4, 1, 0 }
   0xd   : > { %p1755_p8 = por %p220_p5, %p219_p3  ;;  %p227_p9 = scmp.lt.s32.totalorder %s1655_s29, 3 }
   0xe   : > { %s1761_s14 = scalar_select %p201_p7, %s1643_s26, %s203_s10  }
   0xf   : > { %s1997_s13 = scalar_select %p1755_p8, 1, 0 }
  0x10   : > { %p1763_p10 = pnand %p1247_p6, %p227_p9  ;;  %p1767_p11 = scmp.eq.s32.totalorder %s1245_s30, 0 }
  0x11   : > { %s1657_s17 = smov [#allocation2]   ;;  %s1545_s22 = scalar_lea.hbm %s1989_s5, 512 }
  0x12   : > { %s1998_s15 = scalar_select %p1763_p10, 1, 0 }
  0x13   : > { %s1999_s16 = scalar_select %p1767_p11, 1, 0 }
  0x14   : > { %p1445_p12 = pneg %p1763_p10  ;;  %s248_s18 = sshll.u32 %s1657_s17, 4  ;;  %s249_s18 = int_to_ptr.vmem [resolvable:$true] %s248_s18 }
  0x15   : > { %p1546_p0 = scmp.ne.s32.totalorder %s1989_s5, %s1545_s22  ;;  %p1552_p5 = scmp.lt.u32.totalorder %s1545_s22, %s1989_s5 }
  0x16   : > { %p1775_p13 = pnand %p1767_p11, %p1445_p12 }
  0x18   : > { %p1547_p1 = pneg %p1775_p13 }
  0x1a   : > { %p1548_p2 = pnand %p1547_p1, %p1546_p0 }
  0x1c   : > { %p1549_p3 = pneg %p1548_p2 }
  0x1e   : > { %p1554_p6 = pnand %p1552_p5, %p1549_p3 }
  0x20   : > { %1557 = shalt.err (!%p1554_p6)
}
  0x21   : > { %s1558_s12 = scalar_lea.vmem %s249_s18, 512  ;;  %p1566_p8 = scmp.lt.s32.totalorder %s249_s18, %s249_s18 }
  0x22   : > { %p1559_p7 = scmp.ne.s32.totalorder %s249_s18, %s1558_s12  ;;  %p1567_p4 = scmp.lt.s32.totalorder %s1558_s12, %s1558_s12 }
  0x24   : > { %p1561_p9 = pnand %p1559_p7, %p1547_p1  ;;  %p1568_p11 = por %p1567_p4, %p1566_p8 }
  0x26   : > { %p1562_p12 = pneg %p1561_p9 }
  0x28   : > { %p1569_p10 = pnand %p1568_p11, %p1562_p12 }
  0x2a   : > { %1572 = shalt.err (!%p1569_p10)
}
  0x2b   : > { %s1658_s17 = smov 128   ;;  %s1659_s20 = smov 8  }
  0x2c   : > { %1448 = dma.hbm_to_vmem [thread:$0]  (!%p1775_p13), %s1989_s5, 512, %s249_s18, [#allocation3], %s1658_s17, %s1658_s17, %s1659_s20  }
  0x2d   : > { %p2001_p0 = scmp.ne.s32.totalorder %s1998_s15, 0 }
  0x2e   : > { %p2002_p2 = scmp.ne.s32.totalorder (!%p2001_p0), %s1999_s16, 0 }
  0x2f   : > { %293 = sbr.rel (%p2001_p0) target bundleno = 1098 (0x44a), region = 48 }
  0x36   : > { %1626 = dma.done.wait (%p2002_p2), [#allocation3], 512  }
  0x37   : > { %1628 = vsyncadd (%p2002_p2), [#allocation3], 4294966784  ;;  %p339_p4 = scmp.lt.s32.totalorder %s1647_s27, 1  ;;  %v1660_v0 = vmov 0   ;;  %v1661_v3 = vmov 1   ;;  %v1662_v4 = vmov 2   ;;  %v372_v5 = vlaneseq }
  0x38   : > { %1516 = vset.pattern.permute.xlu1 %v1660_v0  ;;  %1514 = vset.pattern.permute.xlu0 %v1660_v0  ;;  %v361_v11 = vld [vmem:[%s1987_s3] sm:$0x7]  ;;  %vm417_vm0 = vcmask 261120   ;;  %v462_v46 = vld [vmem:[#allocation2 + $0x8] sm:$0xff]  ;;  %v463_v47 = vld [vmem:[#allocation2 + $0x10] sm:$0xff]  ;;  %s1276_s15 = sshll.u32 %s1647_s27, 8 }
  0x39   : > { %s1803_s19 = scalar_select %p339_p4, %s1647_s27, 1  ;;  %v1821_v6 = vshrl.u32 %v372_v5, 7  ;;  %v1257_v28 = vld [vmem:[%s1988_s4] ss:$0 sm:$0xff]  ;;  %v480_v49 = vand.u32 4294901760, %v462_v46  ;;  %v464_v50 = vld [vmem:[#allocation2 + $0x18] sm:$0xff] }
  0x3a   : > { %v461_v45 = vld [vmem:[#allocation2] sm:$0xff]  ;;  %v483_v51 = vand.u32 4294901760, %v463_v47  ;;  %v486_v52 = vand.u32 4294901760, %v464_v50  ;;  %s1934_s10 = scalar_lea.hbm %s1991_s7, %s1276_s15  ;;  %p2003_p10 = scmp.ne.s32.totalorder %s1996_s11, 0 }
  0x3b   : > { %s1274_s18 = sshll.u32 %s1803_s19, 4  ;;  %v388_v7 = vsub.s32 1, %v1821_v6  ;;  %v374_v10 = vsub.s32 0, %v1821_v6  ;;  %v404_v13 = vsub.s32 2, %v1821_v6  ;;  %v477_v48 = vand.u32 4294901760, %v461_v45  ;;  %s335_s19 = sand.u32 1, %s1639_s25  }
  0x3c   : > { %s356_s30 = scalar_lea.vmem %s1985_s1, %s1274_s18  ;;  %v1852_v54 = vpack.c.bf16 %v486_v52, %v483_v51  ;;  %v574_v56 = vsub.f32 %v462_v46, %v480_v49  ;;  %v581_v62 = vsub.f32 %v463_v47, %v483_v51  ;;  %v588_v63 = vsub.f32 %v464_v50, %v486_v52  ;;  %s346_s8 = scalar_lea.vmem %s1984_s0, %s1274_s18  ;;  %v1260_v6 = vld [vmem:[%s1990_s6] ss:$0 sm:$0xff] }
  0x3d   : > { %v1811_v1 = vld [vmem:[%s356_s30 + $0x8] sm:$0xff]  ;;  %v1813_v2 = vld [vmem:[%s356_s30] sm:$0xff]  ;;  %v389_v12 = vrot.slane %v361_v11, %v388_v7  ;;  %v375_v14 = vrot.slane %v361_v11, %v374_v10  ;;  %v405_v19 = vrot.slane %v361_v11, %v404_v13  ;;  %v1850_v53 = vpack.c.bf16 %v480_v49, %v477_v48  ;;  %s1252_s20 = sshll.u32 %s335_s19, 4  ;;  %s1938_s12 = scalar_lea.sflag [#allocation4], %s335_s19 }
  0x3e   : > { %369 = vperm.xlu1 %1516, %v1811_v1   ;;  %364 = vperm.xlu0 %1514, %v1813_v2   ;;  %v567_v55 = vsub.f32 %v461_v45, %v477_v48  ;;  %v575_v58 = vand.u32 4294901760, %v574_v56  ;;  %v589_v5 = vand.u32 4294901760, %v588_v63  ;;  %vm1005_vm1 = vcmp.eq.f32.partialorder %v1813_v2, 0.0  ;;  %s337_s22 = scalar_lea.vmem [#allocation5], %s1252_s20  ;;  %s1665_s27 = smov [#allocation5]  }
  0x3f   : > { %1404 = vmatprep.subr.bf16.mxu0 %v1850_v53  ;;  %1380 = vmatprep.subr.bf16.mxu1 %v1850_v53  ;;  %vm1006_vm2 = vcmp.eq.f32.partialorder %v1811_v1, 0.0  ;;  %vm1027_vm3 = vcmp.eq.f32.partialorder %v1813_v2, 1.0  ;;  %vm1028_vm4 = vcmp.eq.f32.partialorder %v1811_v1, 1.0  ;;  %vm1051_vm5 = vcmp.eq.f32.partialorder %v1813_v2, 2.0  ;;  %s1136_s30 = sshll.u32 %s337_s22, 4  ;;  %s1577_s17 = sshll.u32 %s1665_s27, 4  ;;  %s1936_s30 = int_to_ptr.vmem [resolvable:$true] %s1136_s30  ;;  %s1578_s17 = int_to_ptr.vmem [resolvable:$false] %s1577_s17 }
  0x40   : > { %1406 = vmatpush3.bf16.msra.mxu0 %v1850_v53  ;;  %1382 = vmatpush3.bf16.msra.mxu1 %v1850_v53  ;;  %v568_v57 = vand.u32 4294901760, %v567_v55  ;;  %v576_v61 = vsub.f32 %v574_v56, %v575_v58  ;;  %vm1052_vm6 = vcmp.eq.f32.partialorder %v1811_v1, 2.0  ;;  %s1573_s18 = scalar_lea.vmem %s1936_s30, 256  ;;  %s1579_s20 = scalar_lea.vmem %s1578_s17, 512 }
  0x41   : > { %1408 = vmatprep.subr.bf16.mxu0 %v1852_v54  ;;  %1384 = vmatprep.subr.bf16.mxu1 %v1852_v54  ;;  %p1574_p8 = scmp.ne.s32.totalorder %s1936_s30, %s1573_s18  ;;  %p1580_p1 = scmp.lt.s32.totalorder %s1936_s30, %s1578_s17 }
  0x42   : > { %1517 = vset.pattern.permute.xlu1 %v1661_v3  ;;  %1515 = vset.pattern.permute.xlu0 %v1661_v3  ;;  %v1862_v59 = vpack.c.bf16 %v575_v58, %v568_v57  ;;  %v569_v60 = vsub.f32 %v567_v55, %v568_v57  ;;  %v577_v3 = vand.u32 4294901760, %v576_v61  ;;  %p1581_p3 = scmp.lt.s32.totalorder %s1579_s20, %s1573_s18 }
  0x43   : > { %383 = vperm.xlu1 %1517, %v1811_v1   ;;  %379 = vperm.xlu0 %1515, %v1813_v2   ;;  %p1575_p11 = pnand %p1574_p8, %p2003_p10 }
  0x44   : > { %1410 = vmatpush3.bf16.msra.mxu0 %v1852_v54  ;;  %1386 = vmatpush3.bf16.msra.mxu1 %v1852_v54  ;;  %v570_v0 = vand.u32 4294901760, %v569_v60  ;;  %p1582_p5 = por %p1581_p3, %p1580_p1 }
  0x45   : > { %1412 = vmatprep.subr.bf16.mxu0 %v1862_v59  ;;  %p1576_p13 = pneg %p1575_p11 }
  0x47   : > { %1518 = vset.pattern.permute.xlu1 %v1662_v4  ;;  %1519 = vset.pattern.permute.xlu0 %v1662_v4  ;;  %v582_v4 = vand.u32 4294901760, %v581_v62  ;;  %p1583_p6 = pnand %p1582_p5, %p1576_p13 }
  0x48   : > { %395 = vperm.xlu1 %1518, %v1813_v2   ;;  %399 = vperm.xlu0 %1519, %v1811_v1   ;;  %v1258_v2 = vld [vmem:[%s1988_s4 + $0x1] ss:$0 sm:$0xff] }
  0x49   : > { %v1867_v11 = vpack.c.bf16 %v589_v5, %v582_v4 }
  0xbd   : > { %v370_v8 = vpop.permute.xlu1 %369  ;;  %v365_v9 = vpop.permute.xlu0 %364 }
  0xbe   : > { %v377_v20 = vmul.f32 %v375_v14, %v370_v8  ;;  %v376_v21 = vmul.f32 %v375_v14, %v365_v9  ;;  %v1865_v8 = vpack.c.bf16 %v577_v3, %v570_v0  ;;  %v583_v9 = vsub.f32 %v581_v62, %v582_v4 }
  0xc0   : > { %1388 = vmatprep.subr.bf16.mxu1 %v1865_v8  ;;  %v584_v14 = vand.u32 4294901760, %v583_v9 }
  0xc2   : > { %v384_v15 = vpop.permute.xlu1 %383  ;;  %v380_v16 = vpop.permute.xlu0 %379 }
  0xc3   : > { %v391_v17 = vmul.f32 %v389_v12, %v384_v15  ;;  %v390_v18 = vmul.f32 %v389_v12, %v380_v16  ;;  %v590_v12 = vsub.f32 %v588_v63, %v589_v5 }
  0xc5   : > { %v393_v24 = vadd.f32 %v391_v17, %v377_v20  ;;  %v392_v25 = vadd.f32 %v390_v18, %v376_v21  ;;  %v591_v15 = vand.u32 4294901760, %v590_v12  ;;  %v1872_v17 = vpack.c.bf16 %v574_v56, %v567_v55 }
  0xc6   : > { %v1874_v18 = vpack.c.bf16 %v588_v63, %v581_v62  ;;  %v1664_v20 = vmov 0.0  }
  0xc7   : > { %v396_v22 = vpop.permute.xlu1 %395  ;;  %v400_v23 = vpop.permute.xlu0 %399  ;;  %v1870_v16 = vpack.c.bf16 %v591_v15, %v584_v14  ;;  %v1261_v21 = vsel %vm1005_vm1, 1.0, %v1664_v20 }
  0xc8   : > { %v406_v26 = vmul.f32 %v405_v19, %v396_v22  ;;  %v407_v27 = vmul.f32 %v405_v19, %v400_v23  ;;  %v1663_v19 = vmov 3   ;;  %v1262_v22 = vsel %vm1006_vm2, 1.0, %v1664_v20 }
  0xc9   : > { %1520 = vset.pattern.permute.xlu1 %v1663_v19  ;;  %1526 = vset.pattern.permute.xlu0 %v1663_v19  ;;  %v1521_v23 = vpack.i.bf16 %v1262_v22, %v1261_v21  ;;  %v1076_v22 = vld [vmem:[%s346_s8 + $0x8] sm:$0xff] }
  0xca   : > { %v408_v29 = vadd.f32 %v406_v26, %v392_v25  ;;  %v409_v30 = vadd.f32 %v407_v27, %v393_v24  ;;  %v1263_v24 = vsel %vm1027_vm3, 1.0, %v1664_v20  ;;  %v1264_v25 = vsel %vm1028_vm4, 1.0, %v1664_v20 }
  0xcb   : > { %v1527_v26 = vpack.i.bf16 %v1264_v25, %v1263_v24  ;;  %v1265_v27 = vsel %vm1051_vm5, 1.0, %v1664_v20 }
  0xcc   : > { %v415_v31 = vadd.f32 %v1257_v28, %v408_v29  ;;  %v416_v32 = vadd.f32 %v1257_v28, %v409_v30  ;;  %v1266_v28 = vsel %vm1052_vm6, 1.0, %v1664_v20 }
  0xcd   : > { %v1532_v29 = vpack.i.bf16 %v1266_v28, %v1265_v27 }
  0xce   : > { %v418_v33 = vsel %vm417_vm0, %v415_v31, 0.0  ;;  %v421_v34 = vsel %vm417_vm0, %v416_v32, 0.0 }
  0xcf   : > { %419 = vadd.xlane.f32.xlu1 %v418_v33  ;;  %422 = vadd.xlane.f32.xlu0 %v421_v34 }
 0x15c   : > { %v420_v35 = vpop.xlane.xlu1 %419  ;;  %v423_v36 = vpop.xlane.xlu0 %422 }
 0x15d   : > { %v425_v37 = vmul.f32 0.03125, %v420_v35  ;;  %v426_v38 = vmul.f32 0.03125, %v423_v36 }
 0x15f   : > { %v1840_v39 = vsub.f32 %v415_v31, %v425_v37  ;;  %v1842_v40 = vsub.f32 %v416_v32, %v426_v38 }
 0x161   : > { %v429_v41 = vmul.f32 %v1840_v39, %v1840_v39  ;;  %v430_v42 = vmul.f32 %v1842_v40, %v1842_v40 }
 0x163   : > { %v431_v43 = vsel %vm417_vm0, %v429_v41, 0.0  ;;  %v434_v44 = vsel %vm417_vm0, %v430_v42, 0.0  ;;  %v1259_v41 = vld [vmem:[%s1988_s4 + $0x2] ss:$0 sm:$0xff] }
 0x164   : > { %432 = vadd.xlane.f32.xlu1 %v431_v43  ;;  %435 = vadd.xlane.f32.xlu0 %v434_v44 }
 0x175   : > { %1522 = vperm.xlu1 %1520, %v1521_v23  }
 0x179   : > { %1533 = vperm.xlu1 %1520, %v1532_v29  }
 0x17a   : > { %1528 = vperm.xlu0 %1526, %v1527_v26   ;;  %v1075_v26 = vld [vmem:[%s346_s8] sm:$0xff] }
 0x1f1   : > { %v433_v30 = vpop.xlane.xlu1 %432  ;;  %v436_v31 = vpop.xlane.xlu0 %435 }
 0x1f2   : > { %v437_v32 = vmul.f32 0.03125, %v433_v30  ;;  %v438_v33 = vmul.f32 0.03125, %v436_v31 }
 0x1f4   : > { %v439_v34 = vadd.f32 1e-05, %v437_v32  ;;  %v440_v35 = vadd.f32 1e-05, %v438_v33 }
 0x1f6   : > { %1537 = vrsqrt.f32 %v439_v34 }
 0x1f7   : > { %1539 = vrsqrt.f32 %v440_v35 }
 0x1f9   : > { %v1529_v61 = vpop.permute.xlu0 %1528 }
 0x1fa   : > { %v1530_v4 = vunpack.i.l.bf16 %v1529_v61 }
 0x200   : > { %v1538_v36 = vpop.eup %1537 }
 0x201   : > { %v1540_v1 = vpop.eup %1539  ;;  %v443_v37 = vmul.f32 %v1538_v36, %v1840_v39 }
 0x202   : > { %v444_v38 = vmul.f32 %v1540_v1, %v1842_v40 }
 0x203   : > { %v450_v42 = vmul.f32 %v1258_v2, %v443_v37 }
 0x204   : > { %v451_v43 = vmul.f32 %v1258_v2, %v444_v38 }
 0x205   : > { %v457_v44 = vadd.f32 %v1259_v41, %v450_v42 }
 0x206   : > { %v458_v45 = vadd.f32 %v1259_v41, %v451_v43 }
 0x207   : > { %v459_v46 = vmax.f32 %v457_v44, 0.0 }
 0x208   : > { %v460_v47 = vmax.f32 %v458_v45, 0.0 }
 0x209   : > { %v471_v48 = vsel %vm417_vm0, %v459_v46, 0 }
 0x20a   : > { %v545_v49 = vand.u32 4294901760, %v471_v48  ;;  %v474_v50 = vsel %vm417_vm0, %v460_v47, 0 }
 0x20b   : > { %v555_v51 = vand.u32 4294901760, %v474_v50 }
 0x20c   : > { %v546_v52 = vsub.f32 %v471_v48, %v545_v49 }
 0x20d   : > { %v556_v39 = vsub.f32 %v474_v50, %v555_v51 }
 0x20e   : > { %v547_v55 = vand.u32 4294901760, %v546_v52 }
 0x20f   : > { %v557_v40 = vand.u32 4294901760, %v556_v39 }
 0x210   : > { %1354 = vmatprep.mubr.f32.mxu0 %v547_v55  ;;  %v548_v56 = vsub.f32 %v546_v52, %v547_v55 }
 0x211   : > { %1355 = vmatmul.mubr.f32.vlgmr.msra.gmra.mrb[0].mxu0 %v557_v40  ;;  %v558_v57 = vsub.f32 %v556_v39, %v557_v40 }
 0x212   : > { %1414 = vmatpush3.bf16.msra.mxu0 %v1862_v59  ;;  %1365 = vmatprep.mubr.f32.mxu0 %v545_v49  ;;  %v549_v58 = vand.u32 4294901760, %v548_v56  ;;  %v1523_v59 = vpop.permute.xlu1 %1522 }
 0x213   : > { %v559_v60 = vand.u32 4294901760, %v558_v57  ;;  %1416 = vmatprep.subr.bf16.mxu0 %v1867_v11  ;;  %v1525_v63 = vunpack.i.h.bf16 %v1523_v59  ;;  %v1524_v3 = vunpack.i.l.bf16 %v1523_v59 }
 0x214   : > { %1321 = vmatprep.mubr.f32.mxu1 %v549_v58 }
 0x215   : > { %1322 = vmatmul.mubr.f32.vlgmr.msra.gmra.mrb[0].mxu1 %v559_v60 }
 0x216   : > { %1390 = vmatpush3.bf16.msra.mxu1 %v1865_v8  ;;  %1332 = vmatprep.mubr.f32.mxu1 %v545_v49  ;;  %v1534_v5 = vpop.permute.xlu1 %1533 }
 0x217   : > { %1418 = vmatpush3.bf16.msra.mxu0 %v1867_v11  ;;  %1392 = vmatprep.subr.bf16.mxu1 %v1870_v16  ;;  %v1536_v12 = vunpack.i.h.bf16 %v1534_v5 }
 0x218   : > { %1420 = vmatprep.subr.bf16.mxu0 %v1850_v53 }
 0x21a   : > { %1394 = vmatpush3.bf16.msra.mxu1 %v1870_v16  ;;  %1366 = vmatmul.mubr.f32.vlgmr.msra.gmra.mrb[0].mxu0 %v555_v51  ;;  %v1535_v16 = vunpack.i.l.bf16 %v1534_v5 }
 0x21b   : > { %1422 = vmatpush3.bf16.msra.mxu0 %v1850_v53  ;;  %1376 = vmatprep.mubr.f32.mxu0 %v545_v49  ;;  %v1004_v53 = vld [vmem:[%s1986_s2] sm:$0x7] }
 0x21c   : > { %1396 = vmatprep.subr.bf16.mxu1 %v1872_v17  ;;  %1424 = vmatprep.subr.bf16.mxu0 %v1852_v54  ;;  %v1024_v62 = vrot.slane %v1004_v53, %v374_v10  ;;  %v1046_v0 = vrot.slane %v1004_v53, %v388_v7  ;;  %v1070_v11 = vrot.slane %v1004_v53, %v404_v13  ;;  %v1267_v49 = vld [vmem:[%s1990_s6 + $0x1] ss:$0 sm:$0xff] }
 0x21d   : > { %1333 = vmatmul.mubr.f32.vlgmr.msra.gmra.mrb[0].mxu1 %v555_v51 }
 0x21e   : > { %1398 = vmatpush3.bf16.msra.mxu1 %v1872_v17  ;;  %1343 = vmatprep.mubr.f32.mxu1 %v546_v52  ;;  %v1026_v8 = vmul.f32 %v1525_v63, %v1024_v62  ;;  %v1025_v14 = vmul.f32 %v1524_v3, %v1024_v62  ;;  %v1047_v15 = vmul.f32 %v1530_v4, %v1046_v0 }
 0x21f   : > { %1426 = vmatpush3.bf16.msra.mxu0 %v1852_v54  ;;  %1400 = vmatprep.subr.bf16.mxu1 %v1874_v18  ;;  %v1531_v54 = vunpack.i.h.bf16 %v1529_v61  ;;  %v1072_v10 = vmul.f32 %v1536_v12, %v1070_v11  ;;  %v1071_v19 = vmul.f32 %v1535_v16, %v1070_v11 }
 0x221   : > { %v1048_v9 = vmul.f32 %v1531_v54, %v1046_v0 }
 0x222   : > { %1402 = vmatpush3.bf16.msra.mxu1 %v1874_v18  ;;  %1377 = vmatmul.mubr.f32.vlgmr.msra.gmra.mrb[0].mxu0 %v555_v51  ;;  %v1049_v18 = vadd.f32 %v1047_v15, %v1025_v14  ;;  %v1268_v51 = vld [vmem:[%s1990_s6 + $0x2] ss:$0 sm:$0xff] }
 0x223   : > { %v1050_v17 = vadd.f32 %v1048_v9, %v1026_v8 }
 0x224   : > { %v1073_v23 = vadd.f32 %v1071_v19, %v1049_v18 }
 0x225   : > { %1344 = vmatmul.mubr.f32.vlgmr.msra.gmra.mrb[0].mxu1 %v556_v39  ;;  %v1074_v13 = vadd.f32 %v1072_v10, %v1050_v17 }
 0x226   : > { %v1077_v31 = vadd.f32 %v1075_v26, %v1073_v23 }
 0x227   : > { %v1078_v29 = vadd.f32 %v1076_v22, %v1074_v13 }
 0x2f5   : > { %v1378_v20 = vpop.f32.mrb[0].mxu0 }
 0x2f6   : > { %v994_v7 = vpop.f32.mrb[1].mxu0 }
 0x2f8   : > { %v1345_v21 = vpop.f32.mrb[0].mxu1 }
 0x2f9   : > { %v1427_v24 = vadd.f32 %v1345_v21, %v1260_v6  ;;  %v738_v25 = vpop.f32.mrb[1].mxu1 }
 0x2fa   : > { %v1429_v27 = vadd.f32 %v1260_v6, %v738_v25 }
 0x2fb   : > { %v1428_v28 = vadd.f32 %v1427_v24, %v1378_v20 }
 0x2fc   : > { %v1430_v30 = vadd.f32 %v1429_v27, %v994_v7 }
 0x2fd   : > { %v1080_v32 = vadd.f32 %v1428_v28, %v1078_v29 }
 0x2fe   : > { %v1079_v33 = vadd.f32 %v1430_v30, %v1077_v31 }
 0x2ff   : > { %1083 = vadd.xlane.f32.xlu0 %v1080_v32 }
 0x300   : > { %1081 = vadd.xlane.f32.xlu1 %v1079_v33 }
 0x38c   : > { %v1084_v34 = vpop.xlane.xlu0 %1083 }
 0x38d   : > { %v1082_v35 = vpop.xlane.xlu1 %1081  ;;  %v1087_v36 = vmul.f32 0.0078125, %v1084_v34 }
 0x38e   : > { %v1086_v2 = vmul.f32 0.0078125, %v1082_v35 }
 0x38f   : > { %v1089_v37 = vsub.f32 %v1080_v32, %v1087_v36 }
 0x390   : > { %v1088_v1 = vsub.f32 %v1079_v33, %v1086_v2 }
 0x391   : > { %v1091_v41 = vmul.f32 %v1089_v37, %v1089_v37 }
 0x392   : > { %v1090_v38 = vmul.f32 %v1088_v1, %v1088_v1 }
 0x394   : > { %1092 = vadd.xlane.f32.xlu1 %v1090_v38 }
 0x398   : > { %1094 = vadd.xlane.f32.xlu1 %v1091_v41 }
 0x421   : > { %v1093_v42 = vpop.xlane.xlu1 %1092 }
 0x422   : > { %v1096_v43 = vmul.f32 0.0078125, %v1093_v42 }
 0x424   : > { %v1098_v44 = vadd.f32 1e-05, %v1096_v43 }
 0x425   : > { %v1095_v45 = vpop.xlane.xlu1 %1094 }
 0x426   : > { %1541 = vrsqrt.f32 %v1098_v44  ;;  %v1097_v46 = vmul.f32 0.0078125, %v1095_v45 }
 0x428   : > { %v1099_v47 = vadd.f32 1e-05, %v1097_v46 }
 0x42a   : > { %1543 = vrsqrt.f32 %v1099_v47 }
 0x430   : > { %v1542_v48 = vpop.eup %1541 }
 0x431   : > { %v1102_v50 = vmul.f32 %v1542_v48, %v1088_v1 }
 0x433   : > { %v1109_v52 = vmul.f32 %v1267_v49, %v1102_v50 }
 0x434   : > { %v1544_v39 = vpop.eup %1543 }
 0x435   : > { %v1116_v55 = vadd.f32 %v1268_v51, %v1109_v52  ;;  %v1103_v40 = vmul.f32 %v1544_v39, %v1089_v37 }
 0x437   : > { %v1110_v56 = vmul.f32 %v1267_v49, %v1103_v40  ;;  %1118 = vst [vmem:[%s337_s22] sm:$0xff] %v1116_v55 }
 0x439   : > { %v1117_v57 = vadd.f32 %v1268_v51, %v1110_v56 }
 0x43b   : > { %1119 = vst [vmem:[%s337_s22 + $0x8] sm:$0xff] %v1117_v57 }
 0x43c   : > { %1586 = shalt.err (!%p1583_p6)
}
 0x43d   : > { %s1587_s19 = scalar_lea.hbm %s1934_s10, 256  ;;  %s1591_s15 = scalar_lea.hbm %s1991_s7, 512 }
 0x43e   : > { %p1588_p7 = scmp.ne.s32.totalorder %s1934_s10, %s1587_s19  ;;  %p1592_p0 = scmp.lt.u32.totalorder %s1934_s10, %s1991_s7 }
 0x43f   : > { %p1593_p2 = scmp.lt.u32.totalorder %s1591_s15, %s1587_s19  ;;  %p1595_p8 = scmp.lt.u32.totalorder %s1587_s19, %s1934_s10 }
 0x440   : > { %p1589_p9 = pnand %p1588_p7, %p2003_p10 }
 0x441   : > { %p1594_p4 = por %p1593_p2, %p1592_p0 }
 0x442   : > { %p1590_p12 = pneg %p1589_p9 }
 0x443   : > { %p1596_p11 = por %p1595_p8, %p1594_p4 }
 0x445   : > { %p1597_p13 = pnand %p1596_p11, %p1590_p12 }
 0x447   : > { %1600 = shalt.err (!%p1597_p13)
}
 0x448   : > { %s1666_s8 = smov 128   ;;  %s1667_s18 = smov 8  }
 0x449   : > { %1443 = dma.vmem_to_hbm [thread:$0]  (%p2003_p10), %s1936_s30, 256, %s1934_s10, %s1938_s12, %s1666_s8, %s1666_s8, %s1667_s18  }
 0x44a PF: > { %p1455_p1 = scmp.ge.s32.totalorder %s1655_s29, 2  ;;  %s1151_s27 = sand.u32 1, %s1635_s24  }
 0x44b   : > { %p2004_p3 = scmp.ne.s32.totalorder %s1997_s13, 0  ;;  %s1152_s17 = scalar_lea.sflag [#allocation4], %s1151_s27 }
 0x44d   : > { %p1450_p5 = pnand %p1455_p1, %p2004_p3 }
 0x44f   : > { %1630 = dma.done.wait (!%p1450_p5), %s1152_s17, 256  }
 0x450   : > { %1632 = vsyncadd (!%p1450_p5), %s1152_s17, 4294967040  ;;  %s21_s29 = sadd.s32 1, %s1655_s29   ;;  %s2005_s24 = smov %s1639_s25 }
 0x451   : > { %p18_p6 = scmp.ge.s32.totalorder %s21_s29, 4   ;;  %s2006_s25 = smov %s1643_s26 }
 0x452   : > { %s2007_s26 = smov %s1761_s14  ;;  %s2008_s27 = smov %s1651_s28 }
 0x453   : > { %s2009_s28 = smov %s2011_s9  ;;  %20 = sbr.rel (!%p18_p6) target bundleno = 5 (0x5), region = 91 }
 0x45a   :  { %1157 = vsyncpa [#allocation3], 1 }
 0x45b   :  { %1159 = vsyncpa [#allocation3 + $0x1], 1 }
 0x45c   :  { %1160 = vsyncpa [#allocation4], 1 }
 0x45d   :  { %1162 = vsyncpa [#allocation4 + $0x1], 1 }

</bundles_post_ra>
